<compile_context>
chip_gen: v7x
topology: tpu7x:2x2x1
jax: 0.10.0
libtpu: 0.0.40
codegen_flags: <defaults>
</compile_context>

<pallas_src>
import jax
import jax.numpy as jnp
from jax.experimental import pallas as pl
from jax.experimental.pallas import tpu as pltpu

# Same eyelid landmark indices as the PyTorch buffers (68-point face landmarks).
UPPER_LIDS = (37, 38, 43, 44)
LOWER_LIDS = (41, 40, 47, 46)
_N_PAIRS = len(UPPER_LIDS)

_LID_LO = min(UPPER_LIDS + LOWER_LIDS)          # 37
_LID_HI = max(UPPER_LIDS + LOWER_LIDS) + 1      # 48  (contiguous 11-row sliver)
_UPPER_OFF = tuple(i - _LID_LO for i in UPPER_LIDS)   # (0, 1, 6, 7)
_LOWER_OFF = tuple(i - _LID_LO for i in LOWER_LIDS)   # (4, 3, 10, 9)

_LANE = 128
_MAX_BLOCK_B = 16384       # lanes per grid step (~2 MiB traffic/step; fits everywhere)
_MIN_PALLAS_BATCH = 4096   # below this the fused XLA path wins (launch overhead)
_MIN_SPLIT_BATCH = 8192    # force >=2 tiles above this so both v7x cores are used


def _cdiv(a: int, b: int) -> int:
    return -(-a // b)


def _round_up(x: int, m: int) -> int:
    return ((x + m - 1) // m) * m


def _eye_closure_kernel(pred_ref, gt_ref, out_ref):
    """out[p, b] = | sum_d |pred_up - pred_lo| - sum_d |gt_up - gt_lo| |.

    pred_ref / gt_ref are (2 * D * n_pairs, TB) slabs: rows [0, D*n_pairs) hold
    the upper lids (d-major, row = d*n_pairs + p), rows [D*n_pairs, 2*D*n_pairs)
    hold the matching lower lids.  Batch sits on the lane (fast) axis.
    Output is (n_pairs, TB) float32.
    """
    n_pairs = out_ref.shape[0]
    half = pred_ref.shape[0] // 2          # D * n_pairs
    d_coord = half // n_pairs

    pred = pred_ref[...]
    gt = gt_ref[...]

    # sub/abs in the native dtype (bf16 VPU on v6e/v7x keeps the packed layout);
    # widen to f32 only for the coordinate accumulation + final |dp - dg|.
    dpc = jnp.abs(pred[0:half, :] - pred[half:2 * half, :]).astype(jnp.float32)
    dgc = jnp.abs(gt[0:half, :] - gt[half:2 * half, :]).astype(jnp.float32)

    # Sum over the coordinate dimension with static sublane slices (one add per d).
    dp = dpc[0:n_pairs, :]
    dg = dgc[0:n_pairs, :]
    for d in range(1, d_coord):
        dp = dp + dpc[d * n_pairs:(d + 1) * n_pairs, :]
        dg = dg + dgc[d * n_pairs:(d + 1) * n_pairs, :]

    # Lane-dense store of the per-(pair, batch) partial loss; no XLU reductions.
    # TODO(synk): could fold the 4 pairs with two sublane pltpu.roll + adds for a
    # 1-row output, but the (4, TB) store is already lane-dense and tiny.
    out_ref[...] = jnp.abs(dp - dg)


def _build_lid_slab(x: jax.Array, b_pad: int) -> jax.Array:
    """(B, K, D) -> (2 * D * n_pairs, b_pad): upper rows then lower rows, d-major,
    batch on the lane axis.  Uses a contiguous static slice (no 68-row gather)."""
    b, _, d = x.shape
    sliver = x[:, _LID_LO:_LID_HI, :]                 # (B, 11, D) contiguous slice
    sl = jnp.transpose(sliver, (2, 1, 0))             # (D, 11, B)
    up = sl[:, list(_UPPER_OFF), :].reshape(d * _N_PAIRS, b)   # tiny 11-row index
    lo = sl[:, list(_LOWER_OFF), :].reshape(d * _N_PAIRS, b)
    slab = jnp.concatenate([up, lo], axis=0)          # (2*D*n_pairs, B)
    if b_pad > b:
        slab = jnp.pad(slab, ((0, 0), (0, b_pad - b)))  # zero lanes -> 0 loss
    return slab


def eye_closure_loss_ref(pred_keypoints: jax.Array, keypoints: jax.Array) -> jax.Array:
    """Plain-JAX reference matching the PyTorch module.  Note: diff/abs run in the
    input dtype, the coordinate sum and mean accumulate in f32 (same convention as
    the Pallas path, so both paths agree for bf16 inputs)."""
    up = jnp.asarray(UPPER_LIDS, dtype=jnp.int32)
    lo = jnp.asarray(LOWER_LIDS, dtype=jnp.int32)
    diff_pred = pred_keypoints[:, up] - pred_keypoints[:, lo]   # (B, 4, D)
    diff = keypoints[:, up] - keypoints[:, lo]                  # (B, 4, D)
    dp = jnp.abs(diff_pred).astype(jnp.float32).sum(-1)         # (B, 4)
    dg = jnp.abs(diff).astype(jnp.float32).sum(-1)              # (B, 4)
    return jnp.mean(jnp.abs(dp - dg))


def eye_closure_loss(pred_keypoints: jax.Array, keypoints: jax.Array,
                     *, block_b: int = _MAX_BLOCK_B,
                     min_pallas_batch: int = _MIN_PALLAS_BATCH) -> jax.Array:
    """Pallas-backed equivalent of EyeClosureLoss.forward. Returns a scalar f32."""
    assert pred_keypoints.shape == keypoints.shape
    assert pred_keypoints.ndim == 3
    b, k, d = pred_keypoints.shape
    assert k >= _LID_HI, "need at least 48 keypoints (68-point landmark layout)"

    if b < min_pallas_batch:
        # Small problem: a fused XLA elementwise chain beats wrapper HLOs + launch.
        return eye_closure_loss_ref(pred_keypoints, keypoints)

    # Balanced lane tiles: <128 padded lanes per tile, tiles a multiple of 128.
    num_tiles = _cdiv(b, block_b)
    if b >= _MIN_SPLIT_BATCH and num_tiles < 2:
        num_tiles = 2            # let both v7x TensorCores work ("parallel" axis)
    tb = _round_up(_cdiv(b, num_tiles), _LANE)
    b_pad = num_tiles * tb
    rows = 2 * d * _N_PAIRS      # 16 for 2-D landmarks

    pred_slab = _build_lid_slab(pred_keypoints, b_pad)
    gt_slab = _build_lid_slab(keypoints, b_pad)

    in_spec = pl.BlockSpec((rows, tb), lambda i: (0, i))
    out_spec = pl.BlockSpec((_N_PAIRS, tb), lambda i: (0, i))

    partials = pl.pallas_call(
        _eye_closure_kernel,
        out_shape=jax.ShapeDtypeStruct((_N_PAIRS, b_pad), jnp.float32),
        grid_spec=pltpu.PrefetchScalarGridSpec(
            num_scalar_prefetch=0,
            grid=(num_tiles,),
            in_specs=[in_spec, in_spec],
            out_specs=out_spec,
        ),
        compiler_params=pltpu.CompilerParams(
            dimension_semantics=("parallel",),
        ),
    )(pred_slab, gt_slab)

    # Tiny final combine in the wrapper (padded lanes contribute exactly 0).
    return jnp.sum(partials) / jnp.float32(b * _N_PAIRS)


if __name__ == "__main__":
    key = jax.random.PRNGKey(0)
    k1, k2 = jax.random.split(key)

    # 68-point 2-D facial landmarks; modest batch, Pallas path forced for the test.
    B, K, D = 256, 68, 2
    pred = jax.random.normal(k1, (B, K, D), dtype=jnp.float32)
    gt = jax.random.normal(k2, (B, K, D), dtype=jnp.float32)

    loss = jax.block_until_ready(
        eye_closure_loss(pred, gt, min_pallas_batch=0))
    ref = eye_closure_loss_ref(pred, gt)
    assert jnp.allclose(loss, ref, atol=1e-5, rtol=1e-5), (loss, ref)

    # Non-multiple-of-128 batch exercises lane padding.
    loss_pad = jax.block_until_ready(
        eye_closure_loss(pred[:200], gt[:200], min_pallas_batch=0))
    ref_pad = eye_closure_loss_ref(pred[:200], gt[:200])
    assert jnp.allclose(loss_pad, ref_pad, atol=1e-5, rtol=1e-5), (loss_pad, ref_pad)

    # bf16 inputs: kernel DMAs the packed (16,128) bf16 tile, sub/abs in bf16,
    # accumulation in f32 (same convention as the reference).
    pred_bf16 = pred.astype(jnp.bfloat16)
    gt_bf16 = gt.astype(jnp.bfloat16)
    loss_bf16 = jax.block_until_ready(
        eye_closure_loss(pred_bf16, gt_bf16, min_pallas_batch=0))
    ref_bf16 = eye_closure_loss_ref(pred_bf16, gt_bf16)
    assert jnp.allclose(loss_bf16, ref_bf16, atol=1e-4, rtol=1e-3), (loss_bf16, ref_bf16)

    # Small-batch path (B=2, like a typical unit test) falls back to pure JAX.
    loss_small = jax.block_until_ready(eye_closure_loss(pred[:2], gt[:2]))
    ref_small = eye_closure_loss_ref(pred[:2], gt[:2])
    assert jnp.allclose(loss_small, ref_small, atol=1e-5, rtol=1e-5), (loss_small, ref_small)

    print("KERNEL_OK")
</pallas_src>

<mosaic_0001>
module attributes {stable_mosaic.version = 11 : i64} {
  func.func @_eye_closure_kernel(%arg0: i32, %arg1: memref<16x256xf32, #tpu.memory_space<vmem>>, %arg2: memref<16x256xf32, #tpu.memory_space<vmem>>, %arg3: memref<4x256xf32, #tpu.memory_space<vmem>>) attributes {dimension_semantics = [#tpu.dimension_semantics<parallel>], iteration_bounds = array<i64: 1>, scalar_prefetch = 0 : i64, scratch_operands = 0 : i64, tpu.core_type = #tpu.core_type<tc>, window_params = [{transform_indices = @transform_0, window_bounds = array<i64: 16, 256>}, {transform_indices = @transform_1, window_bounds = array<i64: 16, 256>}, {transform_indices = @transform_2, window_bounds = array<i64: 4, 256>}]} {
    %c0 = arith.constant 0 : index
    %c0_0 = arith.constant 0 : index
    %0 = vector.load %arg1[%c0, %c0_0] : memref<16x256xf32, #tpu.memory_space<vmem>>, vector<16x256xf32>
    %c0_1 = arith.constant 0 : index
    %c0_2 = arith.constant 0 : index
    %1 = vector.load %arg2[%c0_1, %c0_2] : memref<16x256xf32, #tpu.memory_space<vmem>>, vector<16x256xf32>
    %2 = vector.extract_strided_slice %0 {offsets = [0, 0], sizes = [8, 256], strides = [1, 1]} : vector<16x256xf32> to vector<8x256xf32>
    %3 = vector.extract_strided_slice %0 {offsets = [8, 0], sizes = [8, 256], strides = [1, 1]} : vector<16x256xf32> to vector<8x256xf32>
    %4 = arith.subf %2, %3 : vector<8x256xf32>
    %5 = math.absf %4 : vector<8x256xf32>
    %6 = vector.extract_strided_slice %1 {offsets = [0, 0], sizes = [8, 256], strides = [1, 1]} : vector<16x256xf32> to vector<8x256xf32>
    %7 = vector.extract_strided_slice %1 {offsets = [8, 0], sizes = [8, 256], strides = [1, 1]} : vector<16x256xf32> to vector<8x256xf32>
    %8 = arith.subf %6, %7 : vector<8x256xf32>
    %9 = math.absf %8 : vector<8x256xf32>
    %10 = vector.extract_strided_slice %5 {offsets = [0, 0], sizes = [4, 256], strides = [1, 1]} : vector<8x256xf32> to vector<4x256xf32>
    %11 = vector.extract_strided_slice %9 {offsets = [0, 0], sizes = [4, 256], strides = [1, 1]} : vector<8x256xf32> to vector<4x256xf32>
    %12 = vector.extract_strided_slice %5 {offsets = [4, 0], sizes = [4, 256], strides = [1, 1]} : vector<8x256xf32> to vector<4x256xf32>
    %13 = arith.addf %10, %12 : vector<4x256xf32>
    %14 = vector.extract_strided_slice %9 {offsets = [4, 0], sizes = [4, 256], strides = [1, 1]} : vector<8x256xf32> to vector<4x256xf32>
    %15 = arith.addf %11, %14 : vector<4x256xf32>
    %16 = arith.subf %13, %15 : vector<4x256xf32>
    %17 = math.absf %16 : vector<4x256xf32>
    %c0_3 = arith.constant 0 : index
    %c0_4 = arith.constant 0 : index
    %18 = vector.load %arg3[%c0_3, %c0_4] : memref<4x256xf32, #tpu.memory_space<vmem>>, vector<4x256xf32>
    tpu.vector_store %arg3[%c0_3, %c0_4], %17 {strides = array<i32>} : memref<4x256xf32, #tpu.memory_space<vmem>>, vector<4x256xf32>,
    return
  }
  func.func @transform_0(%arg0: i32) -> (i32, i32) {
    %c0_i32 = arith.constant 0 : i32
    %c0_i32_0 = arith.constant 0 : i32
    return %c0_i32, %arg0 : i32, i32
  }
  func.func @transform_1(%arg0: i32) -> (i32, i32) {
    %c0_i32 = arith.constant 0 : i32
    %c0_i32_0 = arith.constant 0 : i32
    return %c0_i32, %arg0 : i32, i32
  }
  func.func @transform_2(%arg0: i32) -> (i32, i32) {
    %c0_i32 = arith.constant 0 : i32
    %c0_i32_0 = arith.constant 0 : i32
    return %c0_i32, %arg0 : i32, i32
  }
}

</mosaic_0001>

<bundles_post_ra>
// kernel: tpu_custom_call.1
= control target key start
LH: loop header
LB: loop body
LE: loop exit
PB: predicated region body
PF: predicated region fallthrough
CT: control target
= control target key end

     0   :  { %7 = vsyncpa [#allocation3], 0  ;;  %s230_s0 = inlined_call_operand.hbm [shape: f32[16,256], index: 0, kind: input, shape index: {}]   ;;  %s231_s1 = inlined_call_operand.hbm [shape: f32[16,256], index: 1, kind: input, shape index: {}]   ;;  %s232_s2 = inlined_call_operand.hbm [shape: f32[4,256], index: 2, kind: output, shape index: {}]  }
   0x1   :  { %8 = vsyncpa [#allocation6], 0 }
   0x2   :  { %9 = vsyncpa [#allocation4], 0  ;;  %s174_s9 = smov [#allocation2]   ;;  %s102_s13 = scalar_lea.hbm %s230_s0, 512 }
   0x3   :  { %s15_s10 = sshll.u32 %s174_s9, 4  ;;  %p103_p0 = scmp.ne.s32.totalorder %s230_s0, %s102_s13  ;;  %s16_s10 = int_to_ptr.vmem [resolvable:$true] %s15_s10 }
   0x4   :  { %p106_p1 = scmp.lt.u32.totalorder %s102_s13, %s230_s0 }
   0x6   :  { %p108_p2 = pnand %p106_p1, %p103_p0 }
   0x8   :  { %111 = shalt.err (!%p108_p2)
}
   0x9   :  { %s112_s18 = scalar_lea.vmem %s16_s10, 512  ;;  %p117_p4 = scmp.lt.s32.totalorder %s16_s10, %s16_s10 }
   0xa   :  { %p113_p3 = scmp.ne.s32.totalorder %s16_s10, %s112_s18  ;;  %p118_p5 = scmp.lt.s32.totalorder %s112_s18, %s112_s18 }
   0xc   :  { %p119_p6 = por %p118_p5, %p117_p4 }
   0xe   :  { %p120_p7 = pnand %p119_p6, %p113_p3 }
  0x10   :  { %123 = shalt.err (!%p120_p7)
}
  0x11   :  { %s175_s19 = smov 256   ;;  %s176_s20 = smov 16  }
  0x12   :  { %21 = dma.hbm_to_vmem [thread:$0]  %s230_s0, 512, %s16_s10, [#allocation3], %s175_s19, %s175_s19, %s176_s20  }
  0x13   :  { %s177_s23 = smov [#allocation5]   ;;  %s124_s27 = scalar_lea.hbm %s231_s1, 512 }
  0x14   :  { %s27_s24 = sshll.u32 %s177_s23, 4  ;;  %p125_p8 = scmp.ne.s32.totalorder %s231_s1, %s124_s27  ;;  %s28_s24 = int_to_ptr.vmem [resolvable:$true] %s27_s24 }
  0x15   :  { %p128_p9 = scmp.lt.u32.totalorder %s124_s27, %s231_s1 }
  0x17   :  { %p130_p10 = pnand %p128_p9, %p125_p8 }
  0x19   :  { %133 = shalt.err (!%p130_p10)
}
  0x1a   :  { %s134_s4 = scalar_lea.vmem %s28_s24, 512  ;;  %p139_p12 = scmp.lt.s32.totalorder %s28_s24, %s28_s24 }
  0x1b   :  { %p135_p11 = scmp.ne.s32.totalorder %s28_s24, %s134_s4  ;;  %p140_p13 = scmp.lt.s32.totalorder %s134_s4, %s134_s4 }
  0x1d   :  { %p141_p0 = por %p140_p13, %p139_p12 }
  0x1f   :  { %p142_p1 = pnand %p141_p0, %p135_p11 }
  0x21   :  { %145 = shalt.err (!%p142_p1)
}
  0x22   :  { %33 = dma.hbm_to_vmem [thread:$0]  %s231_s1, 512, %s28_s24, [#allocation6], %s175_s19, %s175_s19, %s176_s20  }
  0x23   :  { %168 = dma.done.wait [#allocation3], 512  }
  0x24   :  { %169 = vsyncadd [#allocation3], 4294966784 }
  0x25   :  { %170 = dma.done.wait [#allocation6], 512  }
  0x26   :  { %171 = vsyncadd [#allocation6], 4294966784  ;;  %v40_v0 = vld [vmem:[#allocation2] sm:$0xff]  ;;  %v41_v1 = vld [vmem:[#allocation2 + $0x8] sm:$0xff]  ;;  %s178_s1 = smov [#allocation7]  }
  0x27   :  { %v42_v2 = vld [vmem:[#allocation2 + $0x10] sm:$0xff]  ;;  %v43_v3 = vld [vmem:[#allocation2 + $0x18] sm:$0xff]  ;;  %v44_v4 = vld [vmem:[#allocation5] sm:$0xff]  ;;  %s87_s6 = sshll.u32 %s178_s1, 4  ;;  %s88_s6 = int_to_ptr.vmem [resolvable:$true] %s87_s6 }
  0x28   :  { %v45_v5 = vld [vmem:[#allocation5 + $0x8] sm:$0xff]  ;;  %v48_v6 = vsub.f32 %v40_v0, %v42_v2  ;;  %v46_v7 = vld [vmem:[#allocation5 + $0x10] sm:$0xff]  ;;  %v47_v8 = vld [vmem:[#allocation5 + $0x18] sm:$0xff]  ;;  %v49_v9 = vsub.f32 %v41_v1, %v43_v3  ;;  %s146_s7 = scalar_lea.vmem %s88_s6, 128  ;;  %p151_p3 = scmp.lt.s32.totalorder %s88_s6, %s88_s6 }
  0x29   :  { %v52_v11 = vsub.f32 %v44_v4, %v46_v7  ;;  %v53_v12 = vsub.f32 %v45_v5, %v47_v8  ;;  %p147_p2 = scmp.ne.s32.totalorder %s88_s6, %s146_s7  ;;  %p152_p4 = scmp.lt.s32.totalorder %s146_s7, %s146_s7 }
  0x2a   :  { %v50_v10 = vand.u32 2147483647, %v48_v6  ;;  %v51_v13 = vand.u32 2147483647, %v49_v9 }
  0x2b   :  { %v54_v14 = vand.u32 2147483647, %v52_v11  ;;  %v55_v15 = vand.u32 2147483647, %v53_v12  ;;  %p153_p5 = por %p152_p4, %p151_p3 }
  0x2c   :  { %v58_v16 = vrot.slane %v50_v10, 4  ;;  %v59_v17 = vrot.slane %v51_v13, 4 }
  0x2d   :  { %v66_v19 = vrot.slane %v54_v14, 4  ;;  %v67_v20 = vrot.slane %v55_v15, 4  ;;  %p154_p6 = pnand %p153_p5, %p147_p2 }
  0x2e   :  { %v62_v18 = vadd.f32 %v58_v16, %v50_v10  ;;  %v63_v21 = vadd.f32 %v59_v17, %v51_v13 }
  0x2f   :  { %v70_v22 = vadd.f32 %v66_v19, %v54_v14  ;;  %v71_v23 = vadd.f32 %v67_v20, %v55_v15 }
  0x31   :  { %v72_v24 = vsub.f32 %v62_v18, %v70_v22  ;;  %v73_v25 = vsub.f32 %v63_v21, %v71_v23 }
  0x33   :  { %v74_v26 = vand.u32 2147483647, %v72_v24  ;;  %v75_v27 = vand.u32 2147483647, %v73_v25 }
  0x35   :  { %v78_v28 = vcombine.low %v74_v26, %v75_v27 }
  0x37   :  { %80 = vst [vmem:[#allocation7] sm:$0xff] %v78_v28 }
  0x38   :  { %157 = shalt.err (!%p154_p6)
}
  0x39   :  { %s158_s10 = scalar_lea.hbm %s232_s2, 128 }
  0x3a   :  { %p159_p7 = scmp.ne.s32.totalorder %s232_s2, %s158_s10  ;;  %p162_p8 = scmp.lt.u32.totalorder %s158_s10, %s232_s2 }
  0x3c   :  { %p164_p9 = pnand %p162_p8, %p159_p7 }
  0x3e   :  { %167 = shalt.err (!%p164_p9)
}
  0x3f   :  { %90 = dma.vmem_to_hbm [thread:$0]  %s88_s6, 128, %s232_s2, [#allocation4]  }
  0x40   :  { %172 = dma.done.wait [#allocation4], 128  }
  0x41   :  { %173 = vsyncadd [#allocation4], 4294967168 }
  0x42   :  { %94 = vsyncpa [#allocation3], 1 }
  0x43   :  { %95 = vsyncpa [#allocation6], 1 }
  0x44   :  { %96 = vsyncpa [#allocation4], 1 }

</bundles_post_ra>
